<compile_context>
chip_gen: v7x
topology: tpu7x:2x2x1
jax: 0.10.0
libtpu: 0.0.40
codegen_flags: <defaults>
</compile_context>

<pallas_src>
import math
import functools

import jax
import jax.numpy as jnp
import numpy as np
from jax.experimental import pallas as pl
from jax.experimental.pallas import tpu as pltpu  # noqa: F401  (TPU backend assumed)

# ---------------- model hyper-parameters (small, consistent with the module) ----
D_MODEL = 32
NHEAD = 4
DIM_FF = 64
HEAD_DIM = D_MODEL // NHEAD
LN_EPS = 1e-5

SEQ = 8
BATCH = 2


# ---------------------------- Pallas kernel -------------------------------------
def _layernorm(y, gamma, beta, eps):
    mean = jnp.mean(y, axis=-1, keepdims=True)
    var = jnp.mean((y - mean) ** 2, axis=-1, keepdims=True)
    return (y - mean) * jax.lax.rsqrt(var + eps) * gamma + beta


def encoder_layer_kernel(x_ref, wqkv_ref, bqkv_ref, wo_ref, w1_ref, b1_ref,
                         w2_ref, vec_ref, out_ref, *, num_heads, seq_len, eps):
    """Fused self-attention + LN1 + FFN + LN2 over the whole (B*L, E) token slab."""
    N, E = x_ref.shape                  # rows are batch-major tokens: n = b*L + l
    L = seq_len
    B = N // L
    hd = E // num_heads
    scale = 1.0 / math.sqrt(hd)

    x = x_ref[...]                      # (N, E)
    wqkv = wqkv_ref[...]                # (E, 3E)   [Wq^T | Wk^T | Wv^T]
    bqkv = bqkv_ref[...]                # (1, 3E)
    wo = wo_ref[...]                    # (E, E)    = Wo^T
    w1 = w1_ref[...]                    # (E, F)    = W1^T
    b1 = b1_ref[...]                    # (1, F)
    w2 = w2_ref[...]                    # (F, E)    = W2^T
    vec = vec_ref[...]                  # (6, E)
    bo = vec[0:1, :]
    g1 = vec[1:2, :]
    be1 = vec[2:3, :]
    b2 = vec[3:4, :]
    g2 = vec[4:5, :]
    be2 = vec[5:6, :]

    # ---- fused QKV projection for ALL tokens (one MXU matmul) -------------------
    qkv = jnp.dot(x, wqkv, preferred_element_type=jnp.float32) + bqkv   # (N, 3E)
    q = (qkv[:, :E] * scale).reshape(B, L, E)     # leading-dim split: free reshape
    k = qkv[:, E:2 * E].reshape(B, L, E)
    v = qkv[:, 2 * E:].reshape(B, L, E)

    # ---- per-head attention, batched over B (flash-attention einsum pattern) ----
    head_outs = []
    for h in range(num_heads):                    # static unroll, 4 heads
        lo, hi = h * hd, (h + 1) * hd
        qh = q[:, :, lo:hi]                       # (B, L, hd)
        kh = k[:, :, lo:hi]
        vh = v[:, :, lo:hi]
        s = jnp.einsum('bqd,bkd->bqk', qh, kh,
                       preferred_element_type=jnp.float32)              # (B, L, L)
        s = s - jnp.max(s, axis=-1, keepdims=True)
        p = jnp.exp(s)
        p = p * pl.reciprocal(jnp.sum(p, axis=-1, keepdims=True), approx=False)
        head_outs.append(jnp.einsum('bqk,bkd->bqd', p, vh,
                                    preferred_element_type=jnp.float32))  # (B, L, hd)
    o = jnp.concatenate(head_outs, axis=-1).reshape(N, E)                # (N, E)

    # ---- output projection + residual + LN1 -------------------------------------
    attn = jnp.dot(o, wo, preferred_element_type=jnp.float32) + bo
    x1 = _layernorm(x + attn, g1, be1, eps)

    # ---- feed-forward + residual + LN2 ------------------------------------------
    h1 = jnp.maximum(jnp.dot(x1, w1, preferred_element_type=jnp.float32) + b1, 0.0)
    y2 = jnp.dot(h1, w2, preferred_element_type=jnp.float32) + b2
    out_ref[...] = _layernorm(x1 + y2, g2, be2, eps)


# ---------------------------- wrapper --------------------------------------------
def transformer_encoder_layer(src, packed_params, src_mask=None,
                              src_key_padding_mask=None):
    """src: (L, B, E) float32. Returns (L, B, E). packed_params from pack_params."""
    assert src_mask is None and src_key_padding_mask is None, \
        "only None masks supported"  # TODO(synk): additive mask support
    L, B, E = src.shape
    # Layout plumbing (tiny): present tokens batch-major as a contiguous (B*L, E) slab.
    x2d = jnp.transpose(src, (1, 0, 2)).reshape(B * L, E)
    kernel = functools.partial(encoder_layer_kernel,
                               num_heads=NHEAD, seq_len=L, eps=LN_EPS)
    # Single invocation, no grid: every operand is a full block resident in VMEM.
    out2d = pl.pallas_call(
        kernel,
        out_shape=jax.ShapeDtypeStruct((B * L, E), jnp.float32),
    )(x2d, *packed_params)
    return jnp.transpose(out2d.reshape(B, L, E), (1, 0, 2))


# ---------------------------- host-side weight packing ---------------------------
def pack_params(params):
    """PyTorch-layout params -> pre-transposed / packed kernel operands."""
    (wq, wk, wv, bq, bk, bv, wo, bo, g1, be1, w1, b1, w2, b2, g2, be2) = params
    E, F = D_MODEL, DIM_FF
    wqkv = jnp.concatenate([wq.T, wk.T, wv.T], axis=1)        # (E, 3E)
    bqkv = jnp.concatenate([bq, bk, bv]).reshape(1, 3 * E)    # (1, 3E)
    wo_t = wo.T                                               # (E, E)
    w1t = w1.T                                                # (E, F)
    b1r = b1.reshape(1, F)
    w2t = w2.T                                                # (F, E)
    vec = jnp.stack([bo, g1, be1, b2, g2, be2], axis=0)       # (6, E)
    return (wqkv, bqkv, wo_t, w1t, b1r, w2t, vec)


# ---------------------------- pure-JAX reference ---------------------------------
def reference_layer(src, params):
    (wq, wk, wv, bq, bk, bv, wo, bo, g1, be1, w1, b1, w2, b2, g2, be2) = params
    L, B, E = src.shape
    x = jnp.transpose(src, (1, 0, 2))                # (B, L, E)

    q = x @ wq.T + bq
    k = x @ wk.T + bk
    v = x @ wv.T + bv
    qh = q.reshape(B, L, NHEAD, HEAD_DIM).transpose(0, 2, 1, 3) / math.sqrt(HEAD_DIM)
    kh = k.reshape(B, L, NHEAD, HEAD_DIM).transpose(0, 2, 1, 3)
    vh = v.reshape(B, L, NHEAD, HEAD_DIM).transpose(0, 2, 1, 3)
    s = jnp.einsum('bhqd,bhkd->bhqk', qh, kh)
    p = jax.nn.softmax(s, axis=-1)
    o = jnp.einsum('bhqk,bhkd->bhqd', p, vh).transpose(0, 2, 1, 3).reshape(B, L, E)
    o = o @ wo.T + bo

    def ln(y, g, bta):
        m = jnp.mean(y, axis=-1, keepdims=True)
        vv = jnp.mean((y - m) ** 2, axis=-1, keepdims=True)
        return (y - m) / jnp.sqrt(vv + LN_EPS) * g + bta

    x1 = ln(x + o, g1, be1)
    h = jnp.maximum(x1 @ w1.T + b1, 0.0)
    x2 = ln(x1 + (h @ w2.T + b2), g2, be2)
    return jnp.transpose(x2, (1, 0, 2))


# ---------------------------- parameter init -------------------------------------
def init_params(key):
    ks = jax.random.split(key, 6)

    def xavier(k, shape):
        fan_out, fan_in = shape
        a = math.sqrt(6.0 / (fan_in + fan_out))
        return jax.random.uniform(k, shape, jnp.float32, -a, a)

    in_proj_w = xavier(ks[0], (3 * D_MODEL, D_MODEL))   # nn.init.xavier_uniform_
    wq, wk, wv = jnp.split(in_proj_w, 3, axis=0)
    bq = jnp.zeros((D_MODEL,), jnp.float32)             # in_proj_bias = 0
    bk = jnp.zeros((D_MODEL,), jnp.float32)
    bv = jnp.zeros((D_MODEL,), jnp.float32)
    wo = xavier(ks[1], (D_MODEL, D_MODEL))
    bo = jnp.zeros((D_MODEL,), jnp.float32)             # out_proj.bias = 0
    g1 = jnp.ones((D_MODEL,), jnp.float32)
    be1 = jnp.zeros((D_MODEL,), jnp.float32)
    w1 = xavier(ks[2], (DIM_FF, D_MODEL))
    b1 = jax.random.uniform(ks[3], (DIM_FF,), jnp.float32, -0.1, 0.1)
    w2 = xavier(ks[4], (D_MODEL, DIM_FF))
    b2 = jax.random.uniform(ks[5], (D_MODEL,), jnp.float32, -0.1, 0.1)
    g2 = jnp.ones((D_MODEL,), jnp.float32)
    be2 = jnp.zeros((D_MODEL,), jnp.float32)
    return (wq, wk, wv, bq, bk, bv, wo, bo, g1, be1, w1, b1, w2, b2, g2, be2)


# ---------------------------- main ------------------------------------------------
if __name__ == "__main__":
    key = jax.random.PRNGKey(0)
    pkey, xkey = jax.random.split(key)
    raw_params = init_params(pkey)
    packed = pack_params(raw_params)                    # host-side, one-time
    src = jax.random.normal(xkey, (SEQ, BATCH, D_MODEL), jnp.float32)

    run = jax.jit(transformer_encoder_layer)
    out = jax.block_until_ready(run(src, packed))

    ref = jax.block_until_ready(reference_layer(src, raw_params))
    assert out.shape == (SEQ, BATCH, D_MODEL)
    np.testing.assert_allclose(np.asarray(out), np.asarray(ref), atol=5e-5, rtol=5e-5)

    print("KERNEL_OK")
</pallas_src>

<mosaic_0001>
module attributes {stable_mosaic.version = 11 : i64} {
  func.func @encoder_layer_kernel(%arg0: memref<16x32xf32, #tpu.memory_space<vmem>>, %arg1: memref<32x96xf32, #tpu.memory_space<vmem>>, %arg2: memref<1x96xf32, #tpu.memory_space<vmem>>, %arg3: memref<32x32xf32, #tpu.memory_space<vmem>>, %arg4: memref<32x64xf32, #tpu.memory_space<vmem>>, %arg5: memref<1x64xf32, #tpu.memory_space<vmem>>, %arg6: memref<64x32xf32, #tpu.memory_space<vmem>>, %arg7: memref<6x32xf32, #tpu.memory_space<vmem>>, %arg8: memref<16x32xf32, #tpu.memory_space<vmem>>) attributes {dimension_semantics = [], scalar_prefetch = 0 : i64, scratch_operands = 0 : i64, tpu.core_type = #tpu.core_type<tc>} {
    %c0 = arith.constant 0 : index
    %c0_0 = arith.constant 0 : index
    %0 = vector.load %arg0[%c0, %c0_0] : memref<16x32xf32, #tpu.memory_space<vmem>>, vector<16x32xf32>
    %c0_1 = arith.constant 0 : index
    %c0_2 = arith.constant 0 : index
    %1 = vector.load %arg1[%c0_1, %c0_2] : memref<32x96xf32, #tpu.memory_space<vmem>>, vector<32x96xf32>
    %c0_3 = arith.constant 0 : index
    %c0_4 = arith.constant 0 : index
    %2 = vector.load %arg2[%c0_3, %c0_4] : memref<1x96xf32, #tpu.memory_space<vmem>>, vector<1x96xf32>
    %c0_5 = arith.constant 0 : index
    %c0_6 = arith.constant 0 : index
    %3 = vector.load %arg3[%c0_5, %c0_6] : memref<32x32xf32, #tpu.memory_space<vmem>>, vector<32x32xf32>
    %c0_7 = arith.constant 0 : index
    %c0_8 = arith.constant 0 : index
    %4 = vector.load %arg4[%c0_7, %c0_8] : memref<32x64xf32, #tpu.memory_space<vmem>>, vector<32x64xf32>
    %c0_9 = arith.constant 0 : index
    %c0_10 = arith.constant 0 : index
    %5 = vector.load %arg5[%c0_9, %c0_10] : memref<1x64xf32, #tpu.memory_space<vmem>>, vector<1x64xf32>
    %c0_11 = arith.constant 0 : index
    %c0_12 = arith.constant 0 : index
    %6 = vector.load %arg6[%c0_11, %c0_12] : memref<64x32xf32, #tpu.memory_space<vmem>>, vector<64x32xf32>
    %c0_13 = arith.constant 0 : index
    %c0_14 = arith.constant 0 : index
    %7 = vector.load %arg7[%c0_13, %c0_14] : memref<6x32xf32, #tpu.memory_space<vmem>>, vector<6x32xf32>
    %8 = vector.extract_strided_slice %7 {offsets = [0, 0], sizes = [1, 32], strides = [1, 1]} : vector<6x32xf32> to vector<1x32xf32>
    %9 = vector.extract_strided_slice %7 {offsets = [1, 0], sizes = [1, 32], strides = [1, 1]} : vector<6x32xf32> to vector<1x32xf32>
    %10 = vector.extract_strided_slice %7 {offsets = [2, 0], sizes = [1, 32], strides = [1, 1]} : vector<6x32xf32> to vector<1x32xf32>
    %11 = vector.extract_strided_slice %7 {offsets = [3, 0], sizes = [1, 32], strides = [1, 1]} : vector<6x32xf32> to vector<1x32xf32>
    %12 = vector.extract_strided_slice %7 {offsets = [4, 0], sizes = [1, 32], strides = [1, 1]} : vector<6x32xf32> to vector<1x32xf32>
    %13 = vector.extract_strided_slice %7 {offsets = [5, 0], sizes = [1, 32], strides = [1, 1]} : vector<6x32xf32> to vector<1x32xf32>
    %cst = arith.constant dense<0.000000e+00> : vector<16x96xf32>
    %14 = tpu.matmul %0, %1, %cst {dimension_numbers = #tpu.dot_dimension_numbers<[1], [0], [0], [1], [0, 0, 1, 1], [], []>} : vector<16x32xf32>, vector<32x96xf32>, vector<16x96xf32> -> vector<16x96xf32>
    %15 = vector.broadcast %2 : vector<1x96xf32> to vector<16x96xf32>
    %16 = arith.addf %14, %15 : vector<16x96xf32>
    %17 = vector.extract_strided_slice %16 {offsets = [0, 0], sizes = [16, 32], strides = [1, 1]} : vector<16x96xf32> to vector<16x32xf32>
    %cst_15 = arith.constant 0.353553385 : f32
    %18 = vector.broadcast %cst_15 : f32 to vector<16x32xf32>
    %19 = arith.mulf %17, %18 : vector<16x32xf32>
    %20 = vector.shape_cast %19 : vector<16x32xf32> to vector<2x8x32xf32>
    %21 = vector.extract_strided_slice %16 {offsets = [0, 32], sizes = [16, 32], strides = [1, 1]} : vector<16x96xf32> to vector<16x32xf32>
    %22 = vector.shape_cast %21 : vector<16x32xf32> to vector<2x8x32xf32>
    %23 = vector.extract_strided_slice %16 {offsets = [0, 64], sizes = [16, 32], strides = [1, 1]} : vector<16x96xf32> to vector<16x32xf32>
    %24 = vector.shape_cast %23 : vector<16x32xf32> to vector<2x8x32xf32>
    %25 = vector.extract_strided_slice %20 {offsets = [0, 0, 0], sizes = [2, 8, 8], strides = [1, 1, 1]} : vector<2x8x32xf32> to vector<2x8x8xf32>
    %26 = vector.extract_strided_slice %22 {offsets = [0, 0, 0], sizes = [2, 8, 8], strides = [1, 1, 1]} : vector<2x8x32xf32> to vector<2x8x8xf32>
    %27 = vector.extract_strided_slice %24 {offsets = [0, 0, 0], sizes = [2, 8, 8], strides = [1, 1, 1]} : vector<2x8x32xf32> to vector<2x8x8xf32>
    "tpu.trace_start"() <{level = 10 : i32, message = "bqd,bkd->bqk"}> : () -> ()
    %cst_16 = arith.constant dense<0.000000e+00> : vector<2x8x8xf32>
    %28 = tpu.matmul %25, %26, %cst_16 {dimension_numbers = #tpu.dot_dimension_numbers<[2], [2], [1], [1], [0, 0, 0, 1, 1, 1], [0], [0]>} : vector<2x8x8xf32>, vector<2x8x8xf32>, vector<2x8x8xf32> -> vector<2x8x8xf32>
    "tpu.trace_stop"() : () -> ()
    %cst_17 = arith.constant dense<0xFF800000> : vector<2x8xf32>
    %29 = vector.multi_reduction <maximumf>, %28, %cst_17 [2] : vector<2x8x8xf32> to vector<2x8xf32>
    %30 = vector.shape_cast %29 : vector<2x8xf32> to vector<2x8x1xf32>
    %31 = vector.broadcast %30 : vector<2x8x1xf32> to vector<2x8x8xf32>
    %32 = arith.subf %28, %31 : vector<2x8x8xf32>
    %33 = math.exp %32 : vector<2x8x8xf32>
    %cst_18 = arith.constant dense<0.000000e+00> : vector<2x8xf32>
    %34 = vector.multi_reduction <add>, %33, %cst_18 [2] : vector<2x8x8xf32> to vector<2x8xf32>
    %35 = vector.shape_cast %34 : vector<2x8xf32> to vector<2x8x1xf32>
    %36 = tpu.reciprocal %35 : vector<2x8x1xf32> -> vector<2x8x1xf32>
    %37 = vector.broadcast %36 : vector<2x8x1xf32> to vector<2x8x8xf32>
    %38 = arith.mulf %33, %37 : vector<2x8x8xf32>
    "tpu.trace_start"() <{level = 10 : i32, message = "bqk,bkd->bqd"}> : () -> ()
    %cst_19 = arith.constant dense<0.000000e+00> : vector<2x8x8xf32>
    %39 = tpu.matmul %38, %27, %cst_19 {dimension_numbers = #tpu.dot_dimension_numbers<[2], [1], [1], [2], [0, 0, 0, 1, 1, 2], [0], [0]>} : vector<2x8x8xf32>, vector<2x8x8xf32>, vector<2x8x8xf32> -> vector<2x8x8xf32>
    "tpu.trace_stop"() : () -> ()
    %40 = vector.extract_strided_slice %20 {offsets = [0, 0, 8], sizes = [2, 8, 8], strides = [1, 1, 1]} : vector<2x8x32xf32> to vector<2x8x8xf32>
    %41 = vector.extract_strided_slice %22 {offsets = [0, 0, 8], sizes = [2, 8, 8], strides = [1, 1, 1]} : vector<2x8x32xf32> to vector<2x8x8xf32>
    %42 = vector.extract_strided_slice %24 {offsets = [0, 0, 8], sizes = [2, 8, 8], strides = [1, 1, 1]} : vector<2x8x32xf32> to vector<2x8x8xf32>
    "tpu.trace_start"() <{level = 10 : i32, message = "bqd,bkd->bqk"}> : () -> ()
    %cst_20 = arith.constant dense<0.000000e+00> : vector<2x8x8xf32>
    %43 = tpu.matmul %40, %41, %cst_20 {dimension_numbers = #tpu.dot_dimension_numbers<[2], [2], [1], [1], [0, 0, 0, 1, 1, 1], [0], [0]>} : vector<2x8x8xf32>, vector<2x8x8xf32>, vector<2x8x8xf32> -> vector<2x8x8xf32>
    "tpu.trace_stop"() : () -> ()
    %cst_21 = arith.constant dense<0xFF800000> : vector<2x8xf32>
    %44 = vector.multi_reduction <maximumf>, %43, %cst_21 [2] : vector<2x8x8xf32> to vector<2x8xf32>
    %45 = vector.shape_cast %44 : vector<2x8xf32> to vector<2x8x1xf32>
    %46 = vector.broadcast %45 : vector<2x8x1xf32> to vector<2x8x8xf32>
    %47 = arith.subf %43, %46 : vector<2x8x8xf32>
    %48 = math.exp %47 : vector<2x8x8xf32>
    %cst_22 = arith.constant dense<0.000000e+00> : vector<2x8xf32>
    %49 = vector.multi_reduction <add>, %48, %cst_22 [2] : vector<2x8x8xf32> to vector<2x8xf32>
    %50 = vector.shape_cast %49 : vector<2x8xf32> to vector<2x8x1xf32>
    %51 = tpu.reciprocal %50 : vector<2x8x1xf32> -> vector<2x8x1xf32>
    %52 = vector.broadcast %51 : vector<2x8x1xf32> to vector<2x8x8xf32>
    %53 = arith.mulf %48, %52 : vector<2x8x8xf32>
    "tpu.trace_start"() <{level = 10 : i32, message = "bqk,bkd->bqd"}> : () -> ()
    %cst_23 = arith.constant dense<0.000000e+00> : vector<2x8x8xf32>
    %54 = tpu.matmul %53, %42, %cst_23 {dimension_numbers = #tpu.dot_dimension_numbers<[2], [1], [1], [2], [0, 0, 0, 1, 1, 2], [0], [0]>} : vector<2x8x8xf32>, vector<2x8x8xf32>, vector<2x8x8xf32> -> vector<2x8x8xf32>
    "tpu.trace_stop"() : () -> ()
    %55 = vector.extract_strided_slice %20 {offsets = [0, 0, 16], sizes = [2, 8, 8], strides = [1, 1, 1]} : vector<2x8x32xf32> to vector<2x8x8xf32>
    %56 = vector.extract_strided_slice %22 {offsets = [0, 0, 16], sizes = [2, 8, 8], strides = [1, 1, 1]} : vector<2x8x32xf32> to vector<2x8x8xf32>
    %57 = vector.extract_strided_slice %24 {offsets = [0, 0, 16], sizes = [2, 8, 8], strides = [1, 1, 1]} : vector<2x8x32xf32> to vector<2x8x8xf32>
    "tpu.trace_start"() <{level = 10 : i32, message = "bqd,bkd->bqk"}> : () -> ()
    %cst_24 = arith.constant dense<0.000000e+00> : vector<2x8x8xf32>
    %58 = tpu.matmul %55, %56, %cst_24 {dimension_numbers = #tpu.dot_dimension_numbers<[2], [2], [1], [1], [0, 0, 0, 1, 1, 1], [0], [0]>} : vector<2x8x8xf32>, vector<2x8x8xf32>, vector<2x8x8xf32> -> vector<2x8x8xf32>
    "tpu.trace_stop"() : () -> ()
    %cst_25 = arith.constant dense<0xFF800000> : vector<2x8xf32>
    %59 = vector.multi_reduction <maximumf>, %58, %cst_25 [2] : vector<2x8x8xf32> to vector<2x8xf32>
    %60 = vector.shape_cast %59 : vector<2x8xf32> to vector<2x8x1xf32>
    %61 = vector.broadcast %60 : vector<2x8x1xf32> to vector<2x8x8xf32>
    %62 = arith.subf %58, %61 : vector<2x8x8xf32>
    %63 = math.exp %62 : vector<2x8x8xf32>
    %cst_26 = arith.constant dense<0.000000e+00> : vector<2x8xf32>
    %64 = vector.multi_reduction <add>, %63, %cst_26 [2] : vector<2x8x8xf32> to vector<2x8xf32>
    %65 = vector.shape_cast %64 : vector<2x8xf32> to vector<2x8x1xf32>
    %66 = tpu.reciprocal %65 : vector<2x8x1xf32> -> vector<2x8x1xf32>
    %67 = vector.broadcast %66 : vector<2x8x1xf32> to vector<2x8x8xf32>
    %68 = arith.mulf %63, %67 : vector<2x8x8xf32>
    "tpu.trace_start"() <{level = 10 : i32, message = "bqk,bkd->bqd"}> : () -> ()
    %cst_27 = arith.constant dense<0.000000e+00> : vector<2x8x8xf32>
    %69 = tpu.matmul %68, %57, %cst_27 {dimension_numbers = #tpu.dot_dimension_numbers<[2], [1], [1], [2], [0, 0, 0, 1, 1, 2], [0], [0]>} : vector<2x8x8xf32>, vector<2x8x8xf32>, vector<2x8x8xf32> -> vector<2x8x8xf32>
    "tpu.trace_stop"() : () -> ()
    %70 = vector.extract_strided_slice %20 {offsets = [0, 0, 24], sizes = [2, 8, 8], strides = [1, 1, 1]} : vector<2x8x32xf32> to vector<2x8x8xf32>
    %71 = vector.extract_strided_slice %22 {offsets = [0, 0, 24], sizes = [2, 8, 8], strides = [1, 1, 1]} : vector<2x8x32xf32> to vector<2x8x8xf32>
    %72 = vector.extract_strided_slice %24 {offsets = [0, 0, 24], sizes = [2, 8, 8], strides = [1, 1, 1]} : vector<2x8x32xf32> to vector<2x8x8xf32>
    "tpu.trace_start"() <{level = 10 : i32, message = "bqd,bkd->bqk"}> : () -> ()
    %cst_28 = arith.constant dense<0.000000e+00> : vector<2x8x8xf32>
    %73 = tpu.matmul %70, %71, %cst_28 {dimension_numbers = #tpu.dot_dimension_numbers<[2], [2], [1], [1], [0, 0, 0, 1, 1, 1], [0], [0]>} : vector<2x8x8xf32>, vector<2x8x8xf32>, vector<2x8x8xf32> -> vector<2x8x8xf32>
    "tpu.trace_stop"() : () -> ()
    %cst_29 = arith.constant dense<0xFF800000> : vector<2x8xf32>
    %74 = vector.multi_reduction <maximumf>, %73, %cst_29 [2] : vector<2x8x8xf32> to vector<2x8xf32>
    %75 = vector.shape_cast %74 : vector<2x8xf32> to vector<2x8x1xf32>
    %76 = vector.broadcast %75 : vector<2x8x1xf32> to vector<2x8x8xf32>
    %77 = arith.subf %73, %76 : vector<2x8x8xf32>
    %78 = math.exp %77 : vector<2x8x8xf32>
    %cst_30 = arith.constant dense<0.000000e+00> : vector<2x8xf32>
    %79 = vector.multi_reduction <add>, %78, %cst_30 [2] : vector<2x8x8xf32> to vector<2x8xf32>
    %80 = vector.shape_cast %79 : vector<2x8xf32> to vector<2x8x1xf32>
    %81 = tpu.reciprocal %80 : vector<2x8x1xf32> -> vector<2x8x1xf32>
    %82 = vector.broadcast %81 : vector<2x8x1xf32> to vector<2x8x8xf32>
    %83 = arith.mulf %78, %82 : vector<2x8x8xf32>
    "tpu.trace_start"() <{level = 10 : i32, message = "bqk,bkd->bqd"}> : () -> ()
    %cst_31 = arith.constant dense<0.000000e+00> : vector<2x8x8xf32>
    %84 = tpu.matmul %83, %72, %cst_31 {dimension_numbers = #tpu.dot_dimension_numbers<[2], [1], [1], [2], [0, 0, 0, 1, 1, 2], [0], [0]>} : vector<2x8x8xf32>, vector<2x8x8xf32>, vector<2x8x8xf32> -> vector<2x8x8xf32>
    "tpu.trace_stop"() : () -> ()
    %85 = tpu.concatenate %39, %54, %69, %84 in 2 : vector<2x8x8xf32>, vector<2x8x8xf32>, vector<2x8x8xf32>, vector<2x8x8xf32> -> vector<2x8x32xf32>
    %86 = vector.shape_cast %85 : vector<2x8x32xf32> to vector<16x32xf32>
    %cst_32 = arith.constant dense<0.000000e+00> : vector<16x32xf32>
    %87 = tpu.matmul %86, %3, %cst_32 {dimension_numbers = #tpu.dot_dimension_numbers<[1], [0], [0], [1], [0, 0, 1, 1], [], []>} : vector<16x32xf32>, vector<32x32xf32>, vector<16x32xf32> -> vector<16x32xf32>
    %88 = vector.broadcast %8 : vector<1x32xf32> to vector<16x32xf32>
    %89 = arith.addf %87, %88 : vector<16x32xf32>
    %90 = arith.addf %0, %89 : vector<16x32xf32>
    %cst_33 = arith.constant dense<0.000000e+00> : vector<16xf32>
    %91 = vector.multi_reduction <add>, %90, %cst_33 [1] : vector<16x32xf32> to vector<16xf32>
    %92 = vector.shape_cast %91 : vector<16xf32> to vector<16x1xf32>
    %cst_34 = arith.constant 3.200000e+01 : f32
    %93 = vector.broadcast %cst_34 : f32 to vector<16x1xf32>
    %94 = arith.divf %92, %93 : vector<16x1xf32>
    %95 = vector.broadcast %94 : vector<16x1xf32> to vector<16x32xf32>
    %96 = arith.subf %90, %95 : vector<16x32xf32>
    %97 = arith.mulf %96, %96 : vector<16x32xf32>
    %cst_35 = arith.constant dense<0.000000e+00> : vector<16xf32>
    %98 = vector.multi_reduction <add>, %97, %cst_35 [1] : vector<16x32xf32> to vector<16xf32>
    %99 = vector.shape_cast %98 : vector<16xf32> to vector<16x1xf32>
    %cst_36 = arith.constant 3.200000e+01 : f32
    %100 = vector.broadcast %cst_36 : f32 to vector<16x1xf32>
    %101 = arith.divf %99, %100 : vector<16x1xf32>
    %102 = vector.broadcast %94 : vector<16x1xf32> to vector<16x32xf32>
    %103 = arith.subf %90, %102 : vector<16x32xf32>
    %cst_37 = arith.constant 9.99999974E-6 : f32
    %104 = vector.broadcast %cst_37 : f32 to vector<16x1xf32>
    %105 = arith.addf %101, %104 : vector<16x1xf32>
    %106 = math.rsqrt %105 : vector<16x1xf32>
    %107 = vector.broadcast %106 : vector<16x1xf32> to vector<16x32xf32>
    %108 = arith.mulf %103, %107 : vector<16x32xf32>
    %109 = vector.broadcast %9 : vector<1x32xf32> to vector<16x32xf32>
    %110 = arith.mulf %108, %109 : vector<16x32xf32>
    %111 = vector.broadcast %10 : vector<1x32xf32> to vector<16x32xf32>
    %112 = arith.addf %110, %111 : vector<16x32xf32>
    %cst_38 = arith.constant dense<0.000000e+00> : vector<16x64xf32>
    %113 = tpu.matmul %112, %4, %cst_38 {dimension_numbers = #tpu.dot_dimension_numbers<[1], [0], [0], [1], [0, 0, 1, 1], [], []>} : vector<16x32xf32>, vector<32x64xf32>, vector<16x64xf32> -> vector<16x64xf32>
    %114 = vector.broadcast %5 : vector<1x64xf32> to vector<16x64xf32>
    %115 = arith.addf %113, %114 : vector<16x64xf32>
    %cst_39 = arith.constant 0.000000e+00 : f32
    %116 = vector.broadcast %cst_39 : f32 to vector<16x64xf32>
    %117 = arith.maximumf %115, %116 : vector<16x64xf32>
    %cst_40 = arith.constant dense<0.000000e+00> : vector<16x32xf32>
    %118 = tpu.matmul %117, %6, %cst_40 {dimension_numbers = #tpu.dot_dimension_numbers<[1], [0], [0], [1], [0, 0, 1, 1], [], []>} : vector<16x64xf32>, vector<64x32xf32>, vector<16x32xf32> -> vector<16x32xf32>
    %119 = vector.broadcast %11 : vector<1x32xf32> to vector<16x32xf32>
    %120 = arith.addf %118, %119 : vector<16x32xf32>
    %121 = arith.addf %112, %120 : vector<16x32xf32>
    %cst_41 = arith.constant dense<0.000000e+00> : vector<16xf32>
    %122 = vector.multi_reduction <add>, %121, %cst_41 [1] : vector<16x32xf32> to vector<16xf32>
    %123 = vector.shape_cast %122 : vector<16xf32> to vector<16x1xf32>
    %cst_42 = arith.constant 3.200000e+01 : f32
    %124 = vector.broadcast %cst_42 : f32 to vector<16x1xf32>
    %125 = arith.divf %123, %124 : vector<16x1xf32>
    %126 = vector.broadcast %125 : vector<16x1xf32> to vector<16x32xf32>
    %127 = arith.subf %121, %126 : vector<16x32xf32>
    %128 = arith.mulf %127, %127 : vector<16x32xf32>
    %cst_43 = arith.constant dense<0.000000e+00> : vector<16xf32>
    %129 = vector.multi_reduction <add>, %128, %cst_43 [1] : vector<16x32xf32> to vector<16xf32>
    %130 = vector.shape_cast %129 : vector<16xf32> to vector<16x1xf32>
    %cst_44 = arith.constant 3.200000e+01 : f32
    %131 = vector.broadcast %cst_44 : f32 to vector<16x1xf32>
    %132 = arith.divf %130, %131 : vector<16x1xf32>
    %133 = vector.broadcast %125 : vector<16x1xf32> to vector<16x32xf32>
    %134 = arith.subf %121, %133 : vector<16x32xf32>
    %cst_45 = arith.constant 9.99999974E-6 : f32
    %135 = vector.broadcast %cst_45 : f32 to vector<16x1xf32>
    %136 = arith.addf %132, %135 : vector<16x1xf32>
    %137 = math.rsqrt %136 : vector<16x1xf32>
    %138 = vector.broadcast %137 : vector<16x1xf32> to vector<16x32xf32>
    %139 = arith.mulf %134, %138 : vector<16x32xf32>
    %140 = vector.broadcast %12 : vector<1x32xf32> to vector<16x32xf32>
    %141 = arith.mulf %139, %140 : vector<16x32xf32>
    %142 = vector.broadcast %13 : vector<1x32xf32> to vector<16x32xf32>
    %143 = arith.addf %141, %142 : vector<16x32xf32>
    %c0_46 = arith.constant 0 : index
    %c0_47 = arith.constant 0 : index
    %144 = vector.load %arg8[%c0_46, %c0_47] : memref<16x32xf32, #tpu.memory_space<vmem>>, vector<16x32xf32>
    tpu.vector_store %arg8[%c0_46, %c0_47], %143 {strides = array<i32>} : memref<16x32xf32, #tpu.memory_space<vmem>>, vector<16x32xf32>,
    return
  }
}

</mosaic_0001>

<bundles_post_ra>
// kernel: transformer_encoder_layer.1
= control target key start
LH: loop header
LB: loop body
LE: loop exit
PB: predicated region body
PF: predicated region fallthrough
CT: control target
= control target key end

     0   :  { %vm60_vm0 = vcmask 261120   ;;  %v2166_v8 = vmov 0.0   ;;  %vm2167_vm1 = vmmov 0   ;;  %vm147_vm2 = vcmask 64512   ;;  %s2170_s18 = smov 88   ;;  %s2171_s19 = smov 120   ;;  %s2484_s1 = inlined_call_operand.vmem [shape: f32[32,96], index: 1, kind: input, shape index: {}]   ;;  %s2485_s0 = inlined_call_operand.vmem [shape: f32[16,32], index: 0, kind: input, shape index: {}]   ;;  %s2486_s2 = inlined_call_operand.vmem [shape: f32[1,96], index: 2, kind: input, shape index: {}]   ;;  %s2487_s3 = inlined_call_operand.vmem [shape: f32[32,32], index: 3, kind: input, shape index: {}]   ;;  %s2488_s7 = inlined_call_operand.vmem [shape: f32[6,32], index: 7, kind: input, shape index: {}]   ;;  %s2489_s4 = inlined_call_operand.vmem [shape: f32[32,64], index: 4, kind: input, shape index: {}]   ;;  %s2490_s6 = inlined_call_operand.vmem [shape: f32[64,32], index: 6, kind: input, shape index: {}]   ;;  %s2491_s5 = inlined_call_operand.vmem [shape: f32[1,64], index: 5, kind: input, shape index: {}]   ;;  %s2492_s8 = inlined_call_operand.vmem [shape: f32[16,32], index: 8, kind: output, shape index: {}]  }
   0x1   :  { %v31_v0 = vld [vmem:[%s2484_s1] sm:$0xff]  ;;  %v32_v1 = vld [vmem:[%s2484_s1 + $0x8] sm:$0xff]  ;;  %v33_v2 = vld [vmem:[%s2484_s1 + $0x10] sm:$0xff]  ;;  %1959 = vmatprep.subr.mxu0 %v2166_v8  ;;  %1961 = vmatprep.mubr.msk.f32.mxu0 %vm2167_vm1, %v2166_v8  ;;  %s2172_s20 = smov 56   ;;  %s2173_s21 = smov 80   ;;  %vm1494_vm3 = vcmask 195584  }
   0x2   :  { %v2070_v3 = vpack.c.bf16 %v32_v1, %v31_v0  ;;  %v34_v4 = vld [vmem:[%s2484_s1 + $0x18] sm:$0xff]  ;;  %v2242_v5 = vld [vmem:[%s2485_s0] sm:$0xff]  ;;  %v2249_v7 = vld [vmem:[%s2485_s0 + $0x8] sm:$0xff]  ;;  %s2168_s0 = smov 96   ;;  %s2174_s22 = smov 112   ;;  %vm1491_vm4 = vcmask 130048  }
   0x3   :  { %v2074_v6 = vpack.c.bf16 %v34_v4, %v33_v2  ;;  %1946 = vmatprep.mubr.msk.f32.mxu1 %vm60_vm0, %v2242_v5  ;;  %v1844_v9 = vld [vmem:[%s2486_s2] ss:$0 sm:$0xff]  ;;  %s2169_s2 = smov 64   ;;  %s2175_s23 = smov 48   ;;  %vm1716_vm5 = vcmask 523264  }
   0x4   :  { %2071 = vmatprep.subr.bf16.mxu1 %v2070_v3  ;;  %s2176_s24 = smov 72   ;;  %s2177_s25 = smov 104  }
   0x5   :  { %2073 = vmatpush3.bf16.msra.mxu1 %v2070_v3  ;;  %s2178_s26 = smov 40   ;;  %s2179_s27 = smov 8  }
   0x6   :  { %2075 = vmatprep.subr.bf16.mxu1 %v2074_v6  ;;  %s2180_s28 = smov 16   ;;  %s2181_s15 = smov 24  }
   0x9   :  { %2077 = vmatpush3.bf16.msra.mxu1 %v2074_v6 }
   0xa   :  { %1949 = vmatprep.subr.mxu1 %v2166_v8 }
   0xc   :  { %1947 = vmatmul.mubr.msk.f32.vlgmr.msra.gmra.mrb[0].mxu1 %vm60_vm0, %v2249_v7 }
   0xd   :  { %1951 = vmatprep.mubr.msk.f32.mxu1 %vm2167_vm1, %v2166_v8 }
  0xdf   :  { %v1948_v10 = vpop.f32.mrb[0].mxu1 }
  0xe0   :  { %v133_v11 = vpop.f32.mrb[1].mxu1  ;;  %v2265_v13 = vadd.f32 %v1948_v10, %v1844_v9 }
  0xe1   :  { %v2262_v12 = vadd.f32 %v1844_v9, %v133_v11 }
  0xe2   :  { %v2279_v17 = vmul.f32 0.35355338, %v2265_v13 }
  0xe3   :  { %145 = vrot.lane.b32.xlu0 %v2262_v12, %s2168_s0  ;;  %v2271_v15 = vmul.f32 0.35355338, %v2262_v12 }
  0xe7   :  { %224 = vrot.lane.b32.xlu0 %v2265_v13, %s2168_s0 }
 0x155   :  { %v146_v14 = vpop.permute.xlu0 %145 }
 0x156   :  { %1950 = vmatpush3.xpose.msk.msra.mxu1 %vm147_vm2, %v146_v14 }
 0x157   :  { %1954 = vmatprep.subr.mxu1 %v2166_v8 }
 0x159   :  { %v225_v16 = vpop.permute.xlu0 %224  ;;  %1952 = vmatmul.mubr.msk.f32.vlgmr.msra.gmra.mrb[2].mxu1 %vm147_vm2, %v2271_v15 }
 0x15a   :  { %1955 = vmatpush3.xpose.msk.msra.mxu1 %vm147_vm2, %v225_v16  ;;  %1956 = vmatprep.mubr.msk.f32.mxu1 %vm2167_vm1, %v2166_v8 }
 0x15b   :  { %1964 = vmatprep.subr.mxu1 %v2166_v8 }
 0x15d   :  { %1957 = vmatmul.mubr.msk.f32.vlgmr.msra.gmra.mrb[4].mxu1 %vm147_vm2, %v2279_v17 }
 0x15e   :  { %1966 = vmatprep.mubr.msk.f32.mxu1 %vm2167_vm1, %v2166_v8 }
 0x22c   :  { %v219_v18 = vpop.f32.mrb[2].mxu1 }
 0x22d   :  { %v1953_v19 = vpop.f32.mrb[3].mxu1  ;;  %v301_v20 = vsel %vm147_vm2, %v219_v18, -inf }
 0x22e   :  { %302 = vmax.xlane.f32.xlu1 %v301_v20 }
 0x230   :  { %v297_v21 = vpop.f32.mrb[4].mxu1 }
 0x231   :  { %v1958_v22 = vpop.f32.mrb[5].mxu1  ;;  %v304_v23 = vsel %vm147_vm2, %v297_v21, -inf }
 0x232   :  { %305 = vmax.xlane.f32.xlu1 %v304_v23 }
 0x243   :  { %323 = vrot.lane.b32.xlu1 %v2262_v12, %s2169_s2 }
 0x247   :  { %399 = vrot.lane.b32.xlu1 %v2265_v13, %s2169_s2 }
 0x24b   :  { %477 = vrot.lane.b32.xlu1 %v2262_v12, %s2170_s18 }
 0x24f   :  { %555 = vrot.lane.b32.xlu1 %v2265_v13, %s2170_s18 }
 0x2bb   :  { %v303_v24 = vpop.xlane.xlu1 %302 }
 0x2bc   :  { %v307_v25 = vsub.f32 %v219_v18, %v303_v24 }
 0x2be   :  { %v309_v26 = vmul.f32 1.442695, %v307_v25 }
 0x2bf   :  { %v306_v27 = vpop.xlane.xlu1 %305 }
 0x2c0   :  { %2126 = vpow2.f32 %v309_v26  ;;  %v308_v28 = vsub.f32 %v297_v21, %v306_v27 }
 0x2c2   :  { %v311_v29 = vmul.f32 1.442695, %v308_v28 }
 0x2c3   :  { %v324_v30 = vpop.permute.xlu1 %323 }
 0x2c4   :  { %2128 = vpow2.f32 %v311_v29  ;;  %1960 = vmatpush3.msra.mxu0 %v324_v30 }
 0x2c5   :  { %1969 = vmatprep.subr.mxu0 %v2166_v8 }
 0x2c7   :  { %v400_v31 = vpop.permute.xlu1 %399 }
 0x2c8   :  { %1965 = vmatpush3.msra.mxu1 %v400_v31 }
 0x2c9   :  { %1974 = vmatprep.subr.mxu1 %v2166_v8 }
 0x2ca   :  { %v2127_v32 = vpop.eup %2126 }
 0x2cb   :  { %v313_v33 = vsel %vm147_vm2, %v2127_v32, 0.0  ;;  %v478_v36 = vpop.permute.xlu1 %477 }
 0x2cc   :  { %314 = vadd.xlane.f32.xlu0 %v313_v33 }
 0x2ce   :  { %v2129_v34 = vpop.eup %2128 }
 0x2cf   :  { %v316_v35 = vsel %vm147_vm2, %v2129_v34, 0.0  ;;  %v556_v37 = vpop.permute.xlu1 %555 }
 0x2d0   :  { %317 = vadd.xlane.f32.xlu1 %v316_v35 }
 0x2e1   :  { %553 = vrot.lane.b32.xlu1 %v2279_v17, %s2171_s19 }
 0x2e2   :  { %475 = vrot.lane.b32.xlu0 %v2271_v15, %s2171_s19 }
 0x359   :  { %v315_v38 = vpop.xlane.xlu0 %314 }
 0x35a   :  { %2130 = vrcp.f32 %v315_v38 }
 0x35d   :  { %v318_v39 = vpop.xlane.xlu1 %317  ;;  %v476_v44 = vpop.permute.xlu0 %475 }
 0x35e   :  { %2132 = vrcp.f32 %v318_v39 }
 0x361   :  { %v554_v45 = vpop.permute.xlu1 %553 }
 0x364   :  { %v2131_v40 = vpop.eup %2130 }
 0x365   :  { %v321_v41 = vmul.f32 %v2131_v40, %v2127_v32 }
 0x367   :  { %1962 = vmatmul.mubr.msk.f32.vlgmr.msra.gmra.mrb[0].mxu0 %vm147_vm2, %v321_v41 }
 0x368   :  { %v2133_v42 = vpop.eup %2132  ;;  %1970 = vmatpush3.xpose.msk.msra.mxu0 %vm147_vm2, %v478_v36  ;;  %1971 = vmatprep.mubr.msk.f32.mxu0 %vm2167_vm1, %v2166_v8 }
 0x369   :  { %v322_v43 = vmul.f32 %v2133_v42, %v2129_v34  ;;  %1979 = vmatprep.subr.mxu0 %v2166_v8 }
 0x36b   :  { %1967 = vmatmul.mubr.msk.f32.vlgmr.msra.gmra.mrb[6].mxu1 %vm147_vm2, %v322_v43  ;;  %1972 = vmatmul.mubr.msk.f32.vlgmr.msra.gmra.mrb[2].mxu0 %vm147_vm2, %v476_v44 }
 0x36c   :  { %1975 = vmatpush3.xpose.msk.msra.mxu1 %vm147_vm2, %v556_v37  ;;  %1976 = vmatprep.mubr.msk.f32.mxu1 %vm2167_vm1, %v2166_v8 }
 0x36d   :  { %1984 = vmatprep.subr.mxu1 %v2166_v8  ;;  %1981 = vmatprep.mubr.msk.f32.mxu0 %vm2167_vm1, %v2166_v8 }
 0x36f   :  { %1977 = vmatmul.mubr.msk.f32.vlgmr.msra.gmra.mrb[8].mxu1 %vm147_vm2, %v554_v45 }
 0x370   :  { %1986 = vmatprep.mubr.msk.f32.mxu1 %vm2167_vm1, %v2166_v8 }
 0x43a   :  { %v2314_v46 = vpop.f32.mrb[0].mxu0 }
 0x43b   :  { %v1963_v47 = vpop.f32.mrb[1].mxu0 }
 0x43e   :  { %v2316_v48 = vpop.f32.mrb[6].mxu1  ;;  %v549_v49 = vpop.f32.mrb[2].mxu0 }
 0x43f   :  { %v1968_v50 = vpop.f32.mrb[7].mxu1  ;;  %v1973_v51 = vpop.f32.mrb[3].mxu0  ;;  %v631_v52 = vsel %vm147_vm2, %v549_v49, -inf }
 0x440   :  { %632 = vmax.xlane.f32.xlu1 %v631_v52 }
 0x442   :  { %v627_v53 = vpop.f32.mrb[8].mxu1 }
 0x443   :  { %v1978_v54 = vpop.f32.mrb[9].mxu1  ;;  %v634_v55 = vsel %vm147_vm2, %v627_v53, -inf }
 0x444   :  { %635 = vmax.xlane.f32.xlu0 %v634_v55 }
 0x451   :  { %653 = vrot.lane.b32.xlu1 %v2262_v12, %s2172_s20 }
 0x455   :  { %807 = vrot.lane.b32.xlu1 %v2262_v12, %s2173_s21 }
 0x459   :  { %885 = vrot.lane.b32.xlu1 %v2265_v13, %s2173_s21 }
 0x45a   :  { %729 = vrot.lane.b32.xlu0 %v2265_v13, %s2172_s20 }
 0x45e   :  { %805 = vrot.lane.b32.xlu0 %v2271_v15, %s2174_s22 }
 0x4cd   :  { %v633_v56 = vpop.xlane.xlu1 %632 }
 0x4ce   :  { %v637_v57 = vsub.f32 %v549_v49, %v633_v56 }
 0x4d0   :  { %v639_v58 = vmul.f32 1.442695, %v637_v57 }
 0x4d1   :  { %v654_v59 = vpop.permute.xlu1 %653  ;;  %v636_v60 = vpop.xlane.xlu0 %635 }
 0x4d2   :  { %2134 = vpow2.f32 %v639_v58  ;;  %v638_v61 = vsub.f32 %v627_v53, %v636_v60  ;;  %1980 = vmatpush3.msra.mxu0 %v654_v59 }
 0x4d3   :  { %1989 = vmatprep.subr.mxu0 %v2166_v8 }
 0x4d4   :  { %v641_v62 = vmul.f32 1.442695, %v638_v61 }
 0x4d5   :  { %v730_v63 = vpop.permute.xlu0 %729  ;;  %v808_v4 = vpop.permute.xlu1 %807 }
 0x4d6   :  { %2136 = vpow2.f32 %v641_v62  ;;  %1985 = vmatpush3.msra.mxu1 %v730_v63 }
 0x4d7   :  { %1994 = vmatprep.subr.mxu1 %v2166_v8 }
 0x4d9   :  { %v886_v6 = vpop.permute.xlu1 %885  ;;  %v806_v19 = vpop.permute.xlu0 %805 }
 0x4dc   :  { %v2135_v0 = vpop.eup %2134 }
 0x4dd   :  { %v643_v1 = vsel %vm147_vm2, %v2135_v0, 0.0 }
 0x4de   :  { %644 = vadd.xlane.f32.xlu1 %v643_v1 }
 0x4e0   :  { %v2137_v2 = vpop.eup %2136 }
 0x4e1   :  { %v646_v3 = vsel %vm147_vm2, %v2137_v2, 0.0 }
 0x4e2   :  { %647 = vadd.xlane.f32.xlu1 %v646_v3 }
 0x4f3   :  { %883 = vrot.lane.b32.xlu1 %v2279_v17, %s2174_s22 }
 0x56b   :  { %v645_v9 = vpop.xlane.xlu1 %644 }
 0x56c   :  { %2138 = vrcp.f32 %v645_v9 }
 0x56f   :  { %v648_v10 = vpop.xlane.xlu1 %647 }
 0x570   :  { %2140 = vrcp.f32 %v648_v10 }
 0x573   :  { %v884_v20 = vpop.permute.xlu1 %883 }
 0x576   :  { %v2139_v11 = vpop.eup %2138 }
 0x577   :  { %v651_v14 = vmul.f32 %v2139_v11, %v2135_v0 }
 0x579   :  { %1982 = vmatmul.mubr.msk.f32.vlgmr.msra.gmra.mrb[4].mxu0 %vm147_vm2, %v651_v14 }
 0x57a   :  { %v2141_v16 = vpop.eup %2140  ;;  %1990 = vmatpush3.xpose.msk.msra.mxu0 %vm147_vm2, %v808_v4  ;;  %1991 = vmatprep.mubr.msk.f32.mxu0 %vm2167_vm1, %v2166_v8 }
 0x57b   :  { %v652_v18 = vmul.f32 %v2141_v16, %v2137_v2  ;;  %1999 = vmatprep.subr.mxu0 %v2166_v8 }
 0x57d   :  { %1987 = vmatmul.mubr.msk.f32.vlgmr.msra.gmra.mrb[10].mxu1 %vm147_vm2, %v652_v18  ;;  %1992 = vmatmul.mubr.msk.f32.vlgmr.msra.gmra.mrb[6].mxu0 %vm147_vm2, %v806_v19 }
 0x57e   :  { %1995 = vmatpush3.xpose.msk.msra.mxu1 %vm147_vm2, %v886_v6  ;;  %1996 = vmatprep.mubr.msk.f32.mxu1 %vm2167_vm1, %v2166_v8 }
 0x57f   :  { %2004 = vmatprep.subr.mxu1 %v2166_v8  ;;  %2001 = vmatprep.mubr.msk.f32.mxu0 %vm2167_vm1, %v2166_v8 }
 0x581   :  { %1997 = vmatmul.mubr.msk.f32.vlgmr.msra.gmra.mrb[12].mxu1 %vm147_vm2, %v884_v20 }
 0x582   :  { %2006 = vmatprep.mubr.msk.f32.mxu1 %vm2167_vm1, %v2166_v8 }
 0x64c   :  { %v2346_v21 = vpop.f32.mrb[4].mxu0 }
 0x64d   :  { %v1983_v22 = vpop.f32.mrb[5].mxu0 }
 0x64e   :  { %v36_v22 = vld [vmem:[%s2487_s3] sm:$0xff] }
 0x650   :  { %v2348_v23 = vpop.f32.mrb[10].mxu1  ;;  %v879_v24 = vpop.f32.mrb[6].mxu0 }
 0x651   :  { %v1988_v25 = vpop.f32.mrb[11].mxu1  ;;  %v1993_v26 = vpop.f32.mrb[7].mxu0  ;;  %v961_v27 = vsel %vm147_vm2, %v879_v24, -inf }
 0x652   :  { %962 = vmax.xlane.f32.xlu0 %v961_v27  ;;  %v39_v25 = vld [vmem:[%s2487_s3 + $0x18] sm:$0xff] }
 0x654   :  { %v957_v28 = vpop.f32.mrb[12].mxu1 }
 0x655   :  { %v1998_v29 = vpop.f32.mrb[13].mxu1  ;;  %v964_v30 = vsel %vm147_vm2, %v957_v28, -inf }
 0x656   :  { %965 = vmax.xlane.f32.xlu1 %v964_v30 }
 0x667   :  { %983 = vrot.lane.b32.xlu1 %v2262_v12, %s2175_s23 }
 0x668   :  { %1059 = vrot.lane.b32.xlu0 %v2265_v13, %s2175_s23 }
 0x66b   :  { %1137 = vrot.lane.b32.xlu1 %v2262_v12, %s2176_s24 }
 0x66f   :  { %1215 = vrot.lane.b32.xlu1 %v2265_v13, %s2176_s24 }
 0x673   :  { %1213 = vrot.lane.b32.xlu1 %v2279_v17, %s2177_s25 }
 0x6df   :  { %v963_v31 = vpop.xlane.xlu0 %962 }
 0x6e0   :  { %v967_v32 = vsub.f32 %v879_v24, %v963_v31  ;;  %v38_v24 = vld [vmem:[%s2487_s3 + $0x10] sm:$0xff] }
 0x6e1   :  { %v2082_v26 = vpack.c.bf16 %v39_v25, %v38_v24 }
 0x6e2   :  { %v969_v33 = vmul.f32 1.442695, %v967_v32 }
 0x6e3   :  { %v1060_v34 = vpop.permute.xlu0 %1059  ;;  %v966_v35 = vpop.xlane.xlu1 %965 }
 0x6e4   :  { %2142 = vpow2.f32 %v969_v33  ;;  %v968_v36 = vsub.f32 %v957_v28, %v966_v35  ;;  %2005 = vmatpush3.msra.mxu1 %v1060_v34 }
 0x6e5   :  { %2014 = vmatprep.subr.mxu1 %v2166_v8 }
 0x6e6   :  { %v971_v37 = vmul.f32 1.442695, %v968_v36 }
 0x6e7   :  { %v984_v38 = vpop.permute.xlu1 %983 }
 0x6e8   :  { %2144 = vpow2.f32 %v971_v37  ;;  %2000 = vmatpush3.msra.mxu0 %v984_v38 }
 0x6e9   :  { %2009 = vmatprep.subr.mxu0 %v2166_v8 }
 0x6eb   :  { %v1138_v44 = vpop.permute.xlu1 %1137 }
 0x6ee   :  { %v2143_v39 = vpop.eup %2142 }
 0x6ef   :  { %v973_v40 = vsel %vm147_vm2, %v2143_v39, 0.0  ;;  %v1216_v50 = vpop.permute.xlu1 %1215 }
 0x6f0   :  { %974 = vadd.xlane.f32.xlu0 %v973_v40 }
 0x6f2   :  { %v2145_v17 = vpop.eup %2144 }
 0x6f3   :  { %v976_v41 = vsel %vm147_vm2, %v2145_v17, 0.0  ;;  %v1214_v52 = vpop.permute.xlu1 %1213 }
 0x6f4   :  { %977 = vadd.xlane.f32.xlu0 %v976_v41 }
 0x70a   :  { %1135 = vrot.lane.b32.xlu0 %v2271_v15, %s2177_s25 }
 0x77d   :  { %v975_v42 = vpop.xlane.xlu0 %974 }
 0x77e   :  { %2146 = vrcp.f32 %v975_v42  ;;  %v1497_v42 = vlaneseq }
 0x781   :  { %v978_v43 = vpop.xlane.xlu0 %977 }
 0x782   :  { %2148 = vrcp.f32 %v978_v43  ;;  %v2406_v43 = vshrl.u32 %v1497_v42, 7 }
 0x784   :  { %v1619_v24 = vsub.s32 2, %v2406_v43 }
 0x785   :  { %v1136_v15 = vpop.permute.xlu0 %1135 }
 0x788   :  { %v2147_v45 = vpop.eup %2146 }
 0x789   :  { %v981_v47 = vmul.f32 %v2147_v45, %v2143_v39 }
 0x78b   :  { %2002 = vmatmul.mubr.msk.f32.vlgmr.msra.gmra.mrb[8].mxu0 %vm147_vm2, %v981_v47 }
 0x78c   :  { %v2149_v49 = vpop.eup %2148  ;;  %2010 = vmatpush3.xpose.msk.msra.mxu0 %vm147_vm2, %v1138_v44  ;;  %2011 = vmatprep.mubr.msk.f32.mxu0 %vm2167_vm1, %v2166_v8  ;;  %v2412_v44 = vld [vmem:[%s2488_s7] sm:$0x3f] }
 0x78d   :  { %v982_v51 = vmul.f32 %v2149_v49, %v2145_v17  ;;  %2019 = vmatprep.subr.mxu0 %v2166_v8 }
 0x78f   :  { %2007 = vmatmul.mubr.msk.f32.vlgmr.msra.gmra.mrb[14].mxu1 %vm147_vm2, %v982_v51  ;;  %2012 = vmatmul.mubr.msk.f32.vlgmr.msra.gmra.mrb[10].mxu0 %vm147_vm2, %v1136_v15 }
 0x790   :  { %2015 = vmatpush3.xpose.msk.msra.mxu1 %vm147_vm2, %v1216_v50  ;;  %2016 = vmatprep.mubr.msk.f32.mxu1 %vm2167_vm1, %v2166_v8 }
 0x791   :  { %2024 = vmatprep.subr.mxu1 %v2166_v8  ;;  %2021 = vmatprep.mubr.msk.f32.mxu0 %vm2167_vm1, %v2166_v8 }
 0x793   :  { %2017 = vmatmul.mubr.msk.f32.vlgmr.msra.gmra.mrb[16].mxu1 %vm147_vm2, %v1214_v52 }
 0x794   :  { %2026 = vmatprep.mubr.msk.f32.mxu1 %vm2167_vm1, %v2166_v8 }
 0x85e   :  { %v1055_v53 = vpop.f32.mrb[8].mxu0 }
 0x85f   :  { %v2003_v54 = vpop.f32.mrb[9].mxu0 }
 0x862   :  { %v1131_v55 = vpop.f32.mrb[14].mxu1  ;;  %v1209_v56 = vpop.f32.mrb[10].mxu0 }
 0x863   :  { %v2008_v57 = vpop.f32.mrb[15].mxu1  ;;  %v2013_v58 = vpop.f32.mrb[11].mxu0  ;;  %v1291_v59 = vsel %vm147_vm2, %v1209_v56, -inf }
 0x864   :  { %1292 = vmax.xlane.f32.xlu0 %v1291_v59 }
 0x866   :  { %v1287_v60 = vpop.f32.mrb[16].mxu1 }
 0x867   :  { %v2018_v61 = vpop.f32.mrb[17].mxu1  ;;  %v1294_v62 = vsel %vm147_vm2, %v1287_v60, -inf }
 0x868   :  { %1295 = vmax.xlane.f32.xlu1 %v1294_v62 }
 0x879   :  { %1313 = vrot.lane.b32.xlu1 %v2262_v12, %s2178_s26 }
 0x87d   :  { %1467 = vrot.lane.b32.xlu1 %v2346_v21, %s2179_s27 }
 0x881   :  { %1469 = vrot.lane.b32.xlu1 %v2348_v23, %s2179_s27 }
 0x885   :  { %1477 = vrot.lane.b32.xlu1 %v1131_v55, %s2180_s28 }
 0x8f1   :  { %v1293_v8 = vpop.xlane.xlu0 %1292 }
 0x8f2   :  { %v1297_v63 = vsub.f32 %v1209_v56, %v1293_v8  ;;  %v41_v8 = vld [vmem:[%s2489_s4 + $0x8] sm:$0xff] }
 0x8f4   :  { %v1299_v0 = vmul.f32 1.442695, %v1297_v63 }
 0x8f5   :  { %v1296_v1 = vpop.xlane.xlu1 %1295 }
 0x8f6   :  { %2150 = vpow2.f32 %v1299_v0  ;;  %v1298_v2 = vsub.f32 %v1287_v60, %v1296_v1  ;;  %v42_v0 = vld [vmem:[%s2489_s4 + $0x10] sm:$0xff]  ;;  %v43_v1 = vld [vmem:[%s2489_s4 + $0x18] sm:$0xff] }
 0x8f8   :  { %v1301_v3 = vmul.f32 1.442695, %v1298_v2  ;;  %v2090_v2 = vpack.c.bf16 %v43_v1, %v42_v0 }
 0x8f9   :  { %v1314_v4 = vpop.permute.xlu1 %1313 }
 0x8fa   :  { %2152 = vpow2.f32 %v1301_v3  ;;  %2020 = vmatpush3.msra.mxu0 %v1314_v4  ;;  %v45_v3 = vld [vmem:[%s2490_s6] sm:$0xff]  ;;  %v46_v4 = vld [vmem:[%s2490_s6 + $0x8] sm:$0xff] }
 0x8fd   :  { %v1468_v31 = vpop.permute.xlu1 %1467 }
 0x8fe   :  { %v1489_v34 = vsel %vm147_vm2, %v2314_v46, %v1468_v31  ;;  %v1499_v46 = vsub.s32 0, %v2406_v43 }
 0x900   :  { %v2151_v6 = vpop.eup %2150  ;;  %v1500_v45 = vrot.slane %v2412_v44, %v1499_v46 }
 0x901   :  { %v1303_v12 = vsel %vm147_vm2, %v2151_v6, 0.0  ;;  %v1470_v32 = vpop.permute.xlu1 %1469 }
 0x902   :  { %1304 = vadd.xlane.f32.xlu0 %v1303_v12  ;;  %v1490_v39 = vsel %vm147_vm2, %v2316_v48, %v1470_v32  ;;  %v2094_v12 = vpack.c.bf16 %v46_v4, %v45_v3  ;;  %v1828_v4 = vsub.s32 4, %v2406_v43 }
 0x904   :  { %v2153_v9 = vpop.eup %2152 }
 0x905   :  { %v1306_v10 = vsel %vm147_vm2, %v2153_v9, 0.0  ;;  %v1478_v35 = vpop.permute.xlu1 %1477 }
 0x906   :  { %1307 = vadd.xlane.f32.xlu0 %v1306_v10  ;;  %v1493_v40 = vsel %vm1491_vm4, %v1490_v39, %v1478_v35  ;;  %v51_v35 = vld [vmem:[%s2490_s6 + $0x30] sm:$0xff] }
 0x91c   :  { %1389 = vrot.lane.b32.xlu0 %v2265_v13, %s2178_s26  ;;  %v37_v13 = vld [vmem:[%s2487_s3 + $0x8] sm:$0xff] }
 0x91d   :  { %v2078_v23 = vpack.c.bf16 %v37_v13, %v36_v22 }
 0x91f   :  { %2079 = vmatprep.subr.bf16.mxu0 %v2078_v23 }
 0x920   :  { %1475 = vrot.lane.b32.xlu0 %v1055_v53, %s2180_s28 }
 0x98f   :  { %v1305_v11 = vpop.xlane.xlu0 %1304 }
 0x990   :  { %2154 = vrcp.f32 %v1305_v11  ;;  %v49_v11 = vld [vmem:[%s2490_s6 + $0x20] sm:$0xff] }
 0x993   :  { %v1308_v14 = vpop.xlane.xlu0 %1307 }
 0x994   :  { %2156 = vrcp.f32 %v1308_v14  ;;  %v50_v14 = vld [vmem:[%s2490_s6 + $0x28] sm:$0xff] }
 0x997   :  { %v1390_v16 = vpop.permute.xlu0 %1389 }
 0x998   :  { %2025 = vmatpush3.msra.mxu1 %v1390_v16  ;;  %v2102_v16 = vpack.c.bf16 %v50_v14, %v49_v11 }
 0x99a   :  { %v2155_v18 = vpop.eup %2154 }
 0x99b   :  { %v1311_v19 = vmul.f32 %v2155_v18, %v2151_v6  ;;  %v1476_v33 = vpop.permute.xlu0 %1475  ;;  %v47_v6 = vld [vmem:[%s2490_s6 + $0x10] sm:$0xff] }
 0x99c   :  { %v1492_v36 = vsel %vm1491_vm4, %v1489_v34, %v1476_v33 }
 0x99d   :  { %2022 = vmatmul.mubr.msk.f32.vlgmr.msra.gmra.mrb[12].mxu0 %vm147_vm2, %v1311_v19 }
 0x99e   :  { %v2157_v20 = vpop.eup %2156  ;;  %2081 = vmatpush3.bf16.msra.mxu0 %v2078_v23  ;;  %v1613_v23 = vsub.s32 1, %v2406_v43 }
 0x99f   :  { %v1312_v21 = vmul.f32 %v2157_v20, %v2153_v9  ;;  %2083 = vmatprep.subr.bf16.mxu0 %v2082_v26  ;;  %v48_v9 = vld [vmem:[%s2490_s6 + $0x18] sm:$0xff] }
 0x9a0   :  { %v2098_v10 = vpack.c.bf16 %v48_v9, %v47_v6  ;;  %v1614_v25 = vrot.slane %v2412_v44, %v1613_v23  ;;  %v1834_v6 = vsub.s32 5, %v2406_v43 }
 0x9a1   :  { %2027 = vmatmul.mubr.msk.f32.vlgmr.msra.gmra.mrb[18].mxu1 %vm147_vm2, %v1312_v21 }
 0x9a2   :  { %2085 = vmatpush3.bf16.msra.mxu0 %v2082_v26  ;;  %v1835_v11 = vrot.slane %v2412_v44, %v1834_v6 }
 0x9a3   :  { %2095 = vmatprep.subr.bf16.mxu0 %v2094_v12 }
 0xa70   :  { %v1385_v27 = vpop.f32.mrb[12].mxu0 }
 0xa71   :  { %1483 = vrot.lane.b32.xlu0 %v1385_v27, %s2181_s15  ;;  %v2023_v28 = vpop.f32.mrb[13].mxu0 }
 0xa72   :  { %v1620_v28 = vrot.slane %v2412_v44, %v1619_v24 }
 0xa74   :  { %v1461_v29 = vpop.f32.mrb[18].mxu1 }
 0xa75   :  { %1485 = vrot.lane.b32.xlu1 %v1461_v29, %s2181_s15  ;;  %v2028_v30 = vpop.f32.mrb[19].mxu1 }
 0xae3   :  { %v1484_v37 = vpop.permute.xlu0 %1483 }
 0xae4   :  { %v1495_v38 = vsel %vm1494_vm3, %v1492_v36, %v1484_v37  ;;  %v52_v36 = vld [vmem:[%s2490_s6 + $0x38] sm:$0xff] }
 0xae5   :  { %2037 = vmatprep.mubr.msk.f32.mxu0 %vm60_vm0, %v1495_v38  ;;  %v2106_v37 = vpack.c.bf16 %v52_v36, %v51_v35  ;;  %v1873_v38 = vld [vmem:[%s2491_s5] ss:$0 sm:$0xff] }
 0xae7   :  { %v1486_v17 = vpop.permute.xlu1 %1485 }
 0xae8   :  { %v1496_v41 = vsel %vm1494_vm3, %v1493_v40, %v1486_v17 }
 0xae9   :  { %2038 = vmatmul.mubr.msk.f32.vlgmr.msra.gmra.mrb[14].mxu0 %vm60_vm0, %v1496_v41 }
 0xaea   :  { %2097 = vmatpush3.bf16.msra.mxu0 %v2094_v12  ;;  %v1829_v12 = vrot.slane %v2412_v44, %v1828_v4 }
 0xaeb   :  { %2099 = vmatprep.subr.bf16.mxu0 %v2098_v10 }
 0xaee   :  { %2101 = vmatpush3.bf16.msra.mxu0 %v2098_v10 }
 0xaef   :  { %2103 = vmatprep.subr.bf16.mxu0 %v2102_v16 }
 0xaf2   :  { %2105 = vmatpush3.bf16.msra.mxu0 %v2102_v16 }
 0xaf3   :  { %2107 = vmatprep.subr.bf16.mxu0 %v2106_v37 }
 0xaf6   :  { %2109 = vmatpush3.bf16.msra.mxu0 %v2106_v37 }
 0xbbc   :  { %v2039_v47 = vpop.f32.mrb[14].mxu0 }
 0xbbd   :  { %v1579_v49 = vadd.f32 %v2039_v47, %v1500_v45  ;;  %v1573_v48 = vpop.f32.mrb[15].mxu0 }
 0xbbe   :  { %v1574_v50 = vadd.f32 %v1573_v48, %v1500_v45  ;;  %v1714_v45 = vsub.s32 3, %v2406_v43 }
 0xbbf   :  { %v1583_v51 = vadd.f32 %v1579_v49, %v2249_v7 }
 0xbc0   :  { %v1582_v15 = vadd.f32 %v1574_v50, %v2242_v5  ;;  %v40_v5 = vld [vmem:[%s2489_s4] sm:$0xff]  ;;  %v1715_v47 = vrot.slane %v2412_v44, %v1714_v45 }
 0xbc1   :  { %v1587_v52 = vsel %vm60_vm0, %v1583_v51, 0.0  ;;  %v2086_v63 = vpack.c.bf16 %v41_v8, %v40_v5 }
 0xbc2   :  { %1588 = vadd.xlane.f32.xlu1 %v1587_v52  ;;  %v1584_v53 = vsel %vm60_vm0, %v1582_v15, 0.0 }
 0xbc3   :  { %1585 = vadd.xlane.f32.xlu0 %v1584_v53  ;;  %2087 = vmatprep.subr.bf16.mxu1 %v2086_v63 }
 0xbc4   :  { %2089 = vmatpush3.bf16.msra.mxu1 %v2086_v63 }
 0xbc5   :  { %2091 = vmatprep.subr.bf16.mxu1 %v2090_v2 }
 0xbc8   :  { %2093 = vmatpush3.bf16.msra.mxu1 %v2090_v2 }
 0xc4f   :  { %v1589_v54 = vpop.xlane.xlu1 %1588 }
 0xc50   :  { %v1592_v55 = vmul.f32 0.03125, %v1589_v54  ;;  %v1586_v56 = vpop.xlane.xlu0 %1585 }
 0xc51   :  { %v1591_v57 = vmul.f32 0.03125, %v1586_v56 }
 0xc52   :  { %v1594_v58 = vsub.f32 %v1583_v51, %v1592_v55 }
 0xc53   :  { %v1593_v59 = vsub.f32 %v1582_v15, %v1591_v57 }
 0xc54   :  { %v1596_v62 = vmul.f32 %v1594_v58, %v1594_v58 }
 0xc55   :  { %v1595_v60 = vmul.f32 %v1593_v59, %v1593_v59 }
 0xc56   :  { %v1600_v7 = vsel %vm60_vm0, %v1596_v62, 0.0 }
 0xc57   :  { %v1597_v61 = vsel %vm60_vm0, %v1595_v60, 0.0 }
 0xc58   :  { %1598 = vadd.xlane.f32.xlu0 %v1597_v61 }
 0xc5c   :  { %1601 = vadd.xlane.f32.xlu0 %v1600_v7 }
 0xce5   :  { %v1599_v18 = vpop.xlane.xlu0 %1598 }
 0xce6   :  { %v1603_v19 = vmul.f32 0.03125, %v1599_v18 }
 0xce8   :  { %v1605_v20 = vadd.f32 1e-05, %v1603_v19 }
 0xce9   :  { %v1602_v21 = vpop.xlane.xlu0 %1601 }
 0xcea   :  { %2158 = vrsqrt.f32 %v1605_v20  ;;  %v1604_v22 = vmul.f32 0.03125, %v1602_v21 }
 0xcec   :  { %v1606_v13 = vadd.f32 1e-05, %v1604_v22 }
 0xcee   :  { %2160 = vrsqrt.f32 %v1606_v13 }
 0xcf4   :  { %v2159_v26 = vpop.eup %2158 }
 0xcf5   :  { %v1609_v27 = vmul.f32 %v2159_v26, %v1593_v59 }
 0xcf7   :  { %v1615_v29 = vmul.f32 %v1614_v25, %v1609_v27 }
 0xcf8   :  { %v2161_v30 = vpop.eup %2160 }
 0xcf9   :  { %v1610_v31 = vmul.f32 %v2161_v30, %v1594_v58  ;;  %v1621_v32 = vadd.f32 %v1620_v28, %v1615_v29 }
 0xcfb   :  { %v1616_v33 = vmul.f32 %v1614_v25, %v1610_v31  ;;  %2048 = vmatprep.mubr.msk.f32.mxu1 %vm60_vm0, %v1621_v32 }
 0xcfd   :  { %v1622_v34 = vadd.f32 %v1620_v28, %v1616_v33 }
 0xcff   :  { %2049 = vmatmul.mubr.msk.f32.vlgmr.msra.gmra.mrb[20].mxu1 %vm60_vm0, %v1622_v34 }
 0xdd2   :  { %v2050_v39 = vpop.f32.mrb[20].mxu1 }
 0xdd3   :  { %v1707_v40 = vadd.f32 %v2050_v39, %v1873_v38  ;;  %v1701_v17 = vpop.f32.mrb[21].mxu1 }
 0xdd4   :  { %v1702_v41 = vadd.f32 %v1873_v38, %v1701_v17 }
 0xdd5   :  { %v1711_v46 = vmax.f32 %v1707_v40, 0.0 }
 0xdd6   :  { %v1710_v42 = vmax.f32 %v1702_v41, 0.0 }
 0xdd8   :  { %2067 = vmatprep.mubr.msk.f32.mxu0 %vm1716_vm5, %v1710_v42 }
 0xdd9   :  { %2068 = vmatmul.mubr.msk.f32.vlgmr.msra.gmra.mrb[16].mxu0 %vm1716_vm5, %v1711_v46 }
 0xeac   :  { %v2069_v49 = vpop.f32.mrb[16].mxu0 }
 0xead   :  { %v1795_v48 = vadd.f32 %v2069_v49, %v1715_v47  ;;  %v1789_v50 = vpop.f32.mrb[17].mxu0 }
 0xeae   :  { %v1790_v51 = vadd.f32 %v1789_v50, %v1715_v47 }
 0xeaf   :  { %v1799_v15 = vadd.f32 %v1795_v48, %v1622_v34 }
 0xeb0   :  { %v1798_v52 = vadd.f32 %v1790_v51, %v1621_v32 }
 0xeb1   :  { %v1803_v53 = vsel %vm60_vm0, %v1799_v15, 0.0 }
 0xeb2   :  { %1804 = vadd.xlane.f32.xlu0 %v1803_v53  ;;  %v1800_v54 = vsel %vm60_vm0, %v1798_v52, 0.0 }
 0xeb3   :  { %1801 = vadd.xlane.f32.xlu1 %v1800_v54 }
 0xf3f   :  { %v1805_v55 = vpop.xlane.xlu0 %1804 }
 0xf40   :  { %v1807_v56 = vmul.f32 0.03125, %v1805_v55  ;;  %v1802_v57 = vpop.xlane.xlu1 %1801 }
 0xf41   :  { %v1806_v58 = vmul.f32 0.03125, %v1802_v57 }
 0xf42   :  { %v1809_v59 = vsub.f32 %v1799_v15, %v1807_v56 }
 0xf43   :  { %v1808_v60 = vsub.f32 %v1798_v52, %v1806_v58 }
 0xf44   :  { %v1811_v61 = vmul.f32 %v1809_v59, %v1809_v59 }
 0xf45   :  { %v1810_v62 = vmul.f32 %v1808_v60, %v1808_v60 }
 0xf46   :  { %v1815_v7 = vsel %vm60_vm0, %v1811_v61, 0.0 }
 0xf47   :  { %1816 = vadd.xlane.f32.xlu0 %v1815_v7  ;;  %v1812_v5 = vsel %vm60_vm0, %v1810_v62, 0.0 }
 0xf48   :  { %1813 = vadd.xlane.f32.xlu1 %v1812_v5 }
 0xfd4   :  { %v1817_v8 = vpop.xlane.xlu0 %1816 }
 0xfd5   :  { %v1819_v63 = vmul.f32 0.03125, %v1817_v8  ;;  %v1814_v0 = vpop.xlane.xlu1 %1813 }
 0xfd6   :  { %v1818_v1 = vmul.f32 0.03125, %v1814_v0 }
 0xfd7   :  { %v1821_v2 = vadd.f32 1e-05, %v1819_v63 }
 0xfd8   :  { %v1820_v3 = vadd.f32 1e-05, %v1818_v1 }
 0xfd9   :  { %2162 = vrsqrt.f32 %v1821_v2 }
 0xfda   :  { %2164 = vrsqrt.f32 %v1820_v3 }
 0xfe3   :  { %v2163_v9 = vpop.eup %2162 }
 0xfe4   :  { %v2165_v10 = vpop.eup %2164  ;;  %v1825_v14 = vmul.f32 %v2163_v9, %v1809_v59 }
 0xfe5   :  { %v1824_v16 = vmul.f32 %v2165_v10, %v1808_v60 }
 0xfe6   :  { %v1831_v18 = vmul.f32 %v1829_v12, %v1825_v14 }
 0xfe7   :  { %v1830_v19 = vmul.f32 %v1829_v12, %v1824_v16 }
 0xfe8   :  { %v1837_v20 = vadd.f32 %v1835_v11, %v1831_v18 }
 0xfe9   :  { %v1836_v21 = vadd.f32 %v1835_v11, %v1830_v19 }
 0xfea   :  { %1839 = vst.msk [vmem:[%s2492_s8 + $0x8] sm:$0xff] %vm60_vm0, %v1837_v20 }
 0xfeb   :  { %1838 = vst.msk [vmem:[%s2492_s8] sm:$0xff] %vm60_vm0, %v1836_v21 }

</bundles_post_ra>
